<compile_context>
chip_gen: v6e
topology: v6e:2x2x1
jax: 0.10.0
libtpu: 0.0.40
codegen_flags: <defaults>
</compile_context>

<pallas_src>
import math
import functools

import jax
import jax.numpy as jnp
import numpy as np
from jax.experimental import pallas as pl
from jax.experimental.pallas import tpu as pltpu


# ----------------------------------------------------------------------------
# ConstructKernel2d: bilinear scatter of weights into the dilated kernel (glue)
# ----------------------------------------------------------------------------
def construct_kernel_2d(weight, P1, P2, dilation, gain):
    """weight/P1/P2: (Co, Ci/g, Kh, Kw) -> dilated kernel (Co, Ci/g, dh*Kh, dw*Kw)."""
    Co, Cig, Kh, Kw = weight.shape
    dh, dw = dilation
    DKh, DKw = dh * Kh, dw * Kw
    scaling = gain * math.sqrt(Co * Cig * Kh * Kw)  # matches reset_parameters() std
    p_h = jnp.clip(P1 * scaling + (DKh // 2), 0.0, DKh - 1)
    p_w = jnp.clip(P2 * scaling + (DKw // 2), 0.0, DKw - 1)
    ih = jnp.floor(p_h)
    iw = jnp.floor(p_w)
    rh = p_h - ih
    rw = p_w - iw
    ih = ih.astype(jnp.int32)
    iw = iw.astype(jnp.int32)
    # one_hot of an out-of-range index is all-zeros, so the +1 taps drop cleanly.
    A_h = ((1.0 - rh)[..., None] * jax.nn.one_hot(ih, DKh, dtype=weight.dtype)
           + rh[..., None] * jax.nn.one_hot(ih + 1, DKh, dtype=weight.dtype))
    A_w = ((1.0 - rw)[..., None] * jax.nn.one_hot(iw, DKw, dtype=weight.dtype)
           + rw[..., None] * jax.nn.one_hot(iw + 1, DKw, dtype=weight.dtype))
    return jnp.einsum('oikl,oiklh,oiklw->oihw', weight, A_h, A_w)


# ----------------------------------------------------------------------------
# Pallas conv kernel: flattened-image im2col + one MXU matmul per (sample, group)
#
#   x_flat : (N, G, Cig, Hp*Wp)       bf16   (zero-padded image, spatial flattened)
#   w_mat  : (G, Cog, DKh*DKw*Cig)    bf16   (K ordered as (kh, kw, ci))
#   b_col  : (G, Cog, 1)              f32
#   out    : (N, G, Cog, L)           f32    L = (Hv-1)*Wp + Wv  (stride-1 flat output)
#
# The "wrap-around" columns Wv..Wp-1 of every flat output row are garbage and are
# sliced away in the wrapper; L is chosen so the last tap read ends exactly at Hp*Wp.
# ----------------------------------------------------------------------------
def _dcls_conv_pallas(x_flat, w_mat, b_col, *, Wp, DKh, DKw, L):
    N, G, Cig, HWp = x_flat.shape
    _, Cog, K = w_mat.shape
    assert K == DKh * DKw * Cig

    def kernel(x_ref, w_ref, b_ref, o_ref):
        x = x_ref[...].reshape(Cig, HWp)                 # (Cig, Hp*Wp), bf16
        taps = []
        for kh in range(DKh):                            # static tap loop (trace-time)
            for kw in range(DKw):
                off = kh * Wp + kw                       # static contiguous lane window
                taps.append(x[:, off:off + L])           # (Cig, L)
        # im2col patch matrix: K = (kh, kw, ci) rows, flattened spatial in lanes.
        patches = jnp.stack(taps, axis=0).reshape(K, L)  # (K, L), bf16
        w = w_ref[...].reshape(Cog, K)                   # (Cog, K), bf16
        acc = jnp.dot(w, patches,
                      preferred_element_type=jnp.float32)  # single MXU matmul, f32 acc
        out = acc + b_ref[...].reshape(Cog, 1)           # (Cog, L), lane-dense
        o_ref[...] = out.reshape(1, 1, Cog, L).astype(o_ref.dtype)

    return pl.pallas_call(
        kernel,
        out_shape=jax.ShapeDtypeStruct((N, G, Cog, L), jnp.float32),
        grid=(N, G),
        in_specs=[
            pl.BlockSpec((1, 1, Cig, HWp), lambda n, g: (n, g, 0, 0)),
            pl.BlockSpec((1, Cog, K), lambda n, g: (g, 0, 0)),
            pl.BlockSpec((1, Cog, 1), lambda n, g: (g, 0, 0)),
        ],
        out_specs=pl.BlockSpec((1, 1, Cog, L), lambda n, g: (n, g, 0, 0)),
        compiler_params=pltpu.CompilerParams(
            dimension_semantics=("parallel", "parallel"),
            vmem_limit_bytes=32 * 1024 * 1024),
    )(x_flat, w_mat, b_col)


# ----------------------------------------------------------------------------
# Dcls2d forward
# ----------------------------------------------------------------------------
def dcls2d_forward(x_nchw, weight, bias, P, *, stride, padding, dilation,
                   groups, gain):
    dh, dw = dilation
    if dh * dw == 1:
        w_eff = weight                                       # plain conv path
    else:
        w_eff = construct_kernel_2d(weight, P[0], P[1], dilation, gain)

    Co, Cig, DKh, DKw = w_eff.shape
    N, Cin, H, W = x_nchw.shape
    sh, sw = stride
    ph, pw = padding
    Hp, Wp = H + 2 * ph, W + 2 * pw
    Hv, Wv = Hp - DKh + 1, Wp - DKw + 1        # stride-1 valid output extent
    L = (Hv - 1) * Wp + Wv                     # flattened stride-1 output length
    Cog = Co // groups
    K = DKh * DKw * Cig

    if bias is None:
        bias = jnp.zeros((Co,), x_nchw.dtype)

    # Zero padding + spatial flattening; channels stay in dim 1 -> no transposes.
    xp = jnp.pad(x_nchw, ((0, 0), (0, 0), (ph, ph), (pw, pw)))
    x_flat = xp.reshape(N, groups, Cig, Hp * Wp).astype(jnp.bfloat16)

    # Weight as (G, Cog, K) with K ordered (kh, kw, ci) to match the in-kernel patches.
    w_mat = jnp.transpose(w_eff, (0, 2, 3, 1)).reshape(groups, Cog, K).astype(jnp.bfloat16)
    b_col = bias.reshape(groups, Cog, 1).astype(jnp.float32)

    out_flat = _dcls_conv_pallas(x_flat, w_mat, b_col,
                                 Wp=Wp, DKh=DKh, DKw=DKw, L=L)      # (N, G, Cog, L)

    # Back to NCHW with cheap reshapes/slices (no transpose); stride handled by
    # subsampling the stride-1 result.
    out_flat = out_flat.reshape(N, Co, L)
    out_full = jnp.pad(out_flat, ((0, 0), (0, 0), (0, Hv * Wp - L)))
    out = out_full.reshape(N, Co, Hv, Wp)[:, :, ::sh, :Wv:sw]
    return out.astype(x_nchw.dtype)


# ----------------------------------------------------------------------------
if __name__ == "__main__":
    # Dcls2d(in_channels=4, out_channels=8, kernel_size=3, stride=1, padding=2,
    #        dilation=2, groups=1, bias=True, gain=1.0)
    Cin, Cout, Kk = 4, 8, 3
    dilation = (2, 2)
    stride = (1, 1)
    padding = (2, 2)
    groups = 1
    gain = 1.0
    N, H, W = 2, 16, 16
    Cig = Cin // groups

    key = jax.random.PRNGKey(0)
    kx, kw, kb, kp1, kp2 = jax.random.split(key, 5)

    # deterministic, init-matching parameter construction
    fan_in = Cig * Kk * Kk
    bound = 1.0 / math.sqrt(fan_in)   # kaiming_uniform_(a=sqrt(5)) & bias bound
    weight = jax.random.uniform(kw, (Cout, Cig, Kk, Kk), jnp.float32, -bound, bound)
    bias = jax.random.uniform(kb, (Cout,), jnp.float32, -bound, bound)
    p_std = [dilation[i] / 2.0 / (gain * math.sqrt(Cout * Cig * Kk * Kk)) for i in range(2)]
    P = jnp.stack([p_std[0] * jax.random.normal(kp1, (Cout, Cig, Kk, Kk), jnp.float32),
                   p_std[1] * jax.random.normal(kp2, (Cout, Cig, Kk, Kk), jnp.float32)], 0)

    x = jax.random.normal(kx, (N, Cin, H, W), jnp.float32)

    fwd = jax.jit(functools.partial(dcls2d_forward, stride=stride, padding=padding,
                                    dilation=dilation, groups=groups, gain=gain))
    out = jax.block_until_ready(fwd(x, weight, bias, P))

    # --- cross-checks ---------------------------------------------------------
    w_eff = construct_kernel_2d(weight, P[0], P[1], dilation, gain)
    conv = functools.partial(
        jax.lax.conv_general_dilated, window_strides=stride,
        padding=[(padding[0], padding[0]), (padding[1], padding[1])],
        dimension_numbers=('NCHW', 'OIHW', 'NCHW'),
        feature_group_count=groups, precision=jax.lax.Precision.HIGHEST)

    # 1) tight check: same bf16-rounded operands as the kernel, f32 accumulation
    x_bf = x.astype(jnp.bfloat16).astype(jnp.float32)
    w_bf = w_eff.astype(jnp.bfloat16).astype(jnp.float32)
    ref_bf = conv(x_bf, w_bf) + bias[None, :, None, None]
    np.testing.assert_allclose(np.asarray(out), np.asarray(ref_bf), rtol=1e-4, atol=1e-4)

    # 2) loose check vs the full-f32 reference (bf16 MXU operands set the tolerance)
    ref = conv(x, w_eff) + bias[None, :, None, None]
    np.testing.assert_allclose(np.asarray(out), np.asarray(ref), rtol=5e-2, atol=5e-2)

    print("KERNEL_OK")
</pallas_src>

<mosaic_0001>
module attributes {stable_mosaic.version = 11 : i64} {
  func.func @kernel(%arg0: i32, %arg1: i32, %arg2: memref<1x1x4x400xbf16, #tpu.memory_space<vmem>>, %arg3: memref<1x8x144xbf16, #tpu.memory_space<vmem>>, %arg4: memref<1x8x1xf32, #tpu.memory_space<vmem>>, %arg5: memref<1x1x8x295xf32, #tpu.memory_space<vmem>>) attributes {dimension_semantics = [#tpu.dimension_semantics<parallel>, #tpu.dimension_semantics<parallel>], iteration_bounds = array<i64: 2, 1>, scalar_prefetch = 0 : i64, scratch_operands = 0 : i64, tpu.core_type = #tpu.core_type<tc>, window_params = [{transform_indices = @transform_0, window_bounds = array<i64: 1, 1, 4, 400>}, {transform_indices = @transform_1, window_bounds = array<i64: 1, 8, 144>}, {transform_indices = @transform_2, window_bounds = array<i64: 1, 8, 1>}, {transform_indices = @transform_3, window_bounds = array<i64: 1, 1, 8, 295>}]} {
    %c0 = arith.constant 0 : index
    %c0_0 = arith.constant 0 : index
    %c0_1 = arith.constant 0 : index
    %c0_2 = arith.constant 0 : index
    %0 = vector.load %arg2[%c0, %c0_0, %c0_1, %c0_2] : memref<1x1x4x400xbf16, #tpu.memory_space<vmem>>, vector<1x1x4x400xbf16>
    %1 = vector.shape_cast %0 : vector<1x1x4x400xbf16> to vector<4x400xbf16>
    %2 = vector.extract_strided_slice %1 {offsets = [0, 0], sizes = [4, 295], strides = [1, 1]} : vector<4x400xbf16> to vector<4x295xbf16>
    %3 = vector.extract_strided_slice %1 {offsets = [0, 1], sizes = [4, 295], strides = [1, 1]} : vector<4x400xbf16> to vector<4x295xbf16>
    %4 = vector.extract_strided_slice %1 {offsets = [0, 2], sizes = [4, 295], strides = [1, 1]} : vector<4x400xbf16> to vector<4x295xbf16>
    %5 = vector.extract_strided_slice %1 {offsets = [0, 3], sizes = [4, 295], strides = [1, 1]} : vector<4x400xbf16> to vector<4x295xbf16>
    %6 = vector.extract_strided_slice %1 {offsets = [0, 4], sizes = [4, 295], strides = [1, 1]} : vector<4x400xbf16> to vector<4x295xbf16>
    %7 = vector.extract_strided_slice %1 {offsets = [0, 5], sizes = [4, 295], strides = [1, 1]} : vector<4x400xbf16> to vector<4x295xbf16>
    %8 = vector.extract_strided_slice %1 {offsets = [0, 20], sizes = [4, 295], strides = [1, 1]} : vector<4x400xbf16> to vector<4x295xbf16>
    %9 = vector.extract_strided_slice %1 {offsets = [0, 21], sizes = [4, 295], strides = [1, 1]} : vector<4x400xbf16> to vector<4x295xbf16>
    %10 = vector.extract_strided_slice %1 {offsets = [0, 22], sizes = [4, 295], strides = [1, 1]} : vector<4x400xbf16> to vector<4x295xbf16>
    %11 = vector.extract_strided_slice %1 {offsets = [0, 23], sizes = [4, 295], strides = [1, 1]} : vector<4x400xbf16> to vector<4x295xbf16>
    %12 = vector.extract_strided_slice %1 {offsets = [0, 24], sizes = [4, 295], strides = [1, 1]} : vector<4x400xbf16> to vector<4x295xbf16>
    %13 = vector.extract_strided_slice %1 {offsets = [0, 25], sizes = [4, 295], strides = [1, 1]} : vector<4x400xbf16> to vector<4x295xbf16>
    %14 = vector.extract_strided_slice %1 {offsets = [0, 40], sizes = [4, 295], strides = [1, 1]} : vector<4x400xbf16> to vector<4x295xbf16>
    %15 = vector.extract_strided_slice %1 {offsets = [0, 41], sizes = [4, 295], strides = [1, 1]} : vector<4x400xbf16> to vector<4x295xbf16>
    %16 = vector.extract_strided_slice %1 {offsets = [0, 42], sizes = [4, 295], strides = [1, 1]} : vector<4x400xbf16> to vector<4x295xbf16>
    %17 = vector.extract_strided_slice %1 {offsets = [0, 43], sizes = [4, 295], strides = [1, 1]} : vector<4x400xbf16> to vector<4x295xbf16>
    %18 = vector.extract_strided_slice %1 {offsets = [0, 44], sizes = [4, 295], strides = [1, 1]} : vector<4x400xbf16> to vector<4x295xbf16>
    %19 = vector.extract_strided_slice %1 {offsets = [0, 45], sizes = [4, 295], strides = [1, 1]} : vector<4x400xbf16> to vector<4x295xbf16>
    %20 = vector.extract_strided_slice %1 {offsets = [0, 60], sizes = [4, 295], strides = [1, 1]} : vector<4x400xbf16> to vector<4x295xbf16>
    %21 = vector.extract_strided_slice %1 {offsets = [0, 61], sizes = [4, 295], strides = [1, 1]} : vector<4x400xbf16> to vector<4x295xbf16>
    %22 = vector.extract_strided_slice %1 {offsets = [0, 62], sizes = [4, 295], strides = [1, 1]} : vector<4x400xbf16> to vector<4x295xbf16>
    %23 = vector.extract_strided_slice %1 {offsets = [0, 63], sizes = [4, 295], strides = [1, 1]} : vector<4x400xbf16> to vector<4x295xbf16>
    %24 = vector.extract_strided_slice %1 {offsets = [0, 64], sizes = [4, 295], strides = [1, 1]} : vector<4x400xbf16> to vector<4x295xbf16>
    %25 = vector.extract_strided_slice %1 {offsets = [0, 65], sizes = [4, 295], strides = [1, 1]} : vector<4x400xbf16> to vector<4x295xbf16>
    %26 = vector.extract_strided_slice %1 {offsets = [0, 80], sizes = [4, 295], strides = [1, 1]} : vector<4x400xbf16> to vector<4x295xbf16>
    %27 = vector.extract_strided_slice %1 {offsets = [0, 81], sizes = [4, 295], strides = [1, 1]} : vector<4x400xbf16> to vector<4x295xbf16>
    %28 = vector.extract_strided_slice %1 {offsets = [0, 82], sizes = [4, 295], strides = [1, 1]} : vector<4x400xbf16> to vector<4x295xbf16>
    %29 = vector.extract_strided_slice %1 {offsets = [0, 83], sizes = [4, 295], strides = [1, 1]} : vector<4x400xbf16> to vector<4x295xbf16>
    %30 = vector.extract_strided_slice %1 {offsets = [0, 84], sizes = [4, 295], strides = [1, 1]} : vector<4x400xbf16> to vector<4x295xbf16>
    %31 = vector.extract_strided_slice %1 {offsets = [0, 85], sizes = [4, 295], strides = [1, 1]} : vector<4x400xbf16> to vector<4x295xbf16>
    %32 = vector.extract_strided_slice %1 {offsets = [0, 100], sizes = [4, 295], strides = [1, 1]} : vector<4x400xbf16> to vector<4x295xbf16>
    %33 = vector.extract_strided_slice %1 {offsets = [0, 101], sizes = [4, 295], strides = [1, 1]} : vector<4x400xbf16> to vector<4x295xbf16>
    %34 = vector.extract_strided_slice %1 {offsets = [0, 102], sizes = [4, 295], strides = [1, 1]} : vector<4x400xbf16> to vector<4x295xbf16>
    %35 = vector.extract_strided_slice %1 {offsets = [0, 103], sizes = [4, 295], strides = [1, 1]} : vector<4x400xbf16> to vector<4x295xbf16>
    %36 = vector.extract_strided_slice %1 {offsets = [0, 104], sizes = [4, 295], strides = [1, 1]} : vector<4x400xbf16> to vector<4x295xbf16>
    %37 = vector.extract_strided_slice %1 {offsets = [0, 105], sizes = [4, 295], strides = [1, 1]} : vector<4x400xbf16> to vector<4x295xbf16>
    %38 = vector.shape_cast %2 : vector<4x295xbf16> to vector<1x4x295xbf16>
    %39 = vector.shape_cast %3 : vector<4x295xbf16> to vector<1x4x295xbf16>
    %40 = vector.shape_cast %4 : vector<4x295xbf16> to vector<1x4x295xbf16>
    %41 = vector.shape_cast %5 : vector<4x295xbf16> to vector<1x4x295xbf16>
    %42 = vector.shape_cast %6 : vector<4x295xbf16> to vector<1x4x295xbf16>
    %43 = vector.shape_cast %7 : vector<4x295xbf16> to vector<1x4x295xbf16>
    %44 = vector.shape_cast %8 : vector<4x295xbf16> to vector<1x4x295xbf16>
    %45 = vector.shape_cast %9 : vector<4x295xbf16> to vector<1x4x295xbf16>
    %46 = vector.shape_cast %10 : vector<4x295xbf16> to vector<1x4x295xbf16>
    %47 = vector.shape_cast %11 : vector<4x295xbf16> to vector<1x4x295xbf16>
    %48 = vector.shape_cast %12 : vector<4x295xbf16> to vector<1x4x295xbf16>
    %49 = vector.shape_cast %13 : vector<4x295xbf16> to vector<1x4x295xbf16>
    %50 = vector.shape_cast %14 : vector<4x295xbf16> to vector<1x4x295xbf16>
    %51 = vector.shape_cast %15 : vector<4x295xbf16> to vector<1x4x295xbf16>
    %52 = vector.shape_cast %16 : vector<4x295xbf16> to vector<1x4x295xbf16>
    %53 = vector.shape_cast %17 : vector<4x295xbf16> to vector<1x4x295xbf16>
    %54 = vector.shape_cast %18 : vector<4x295xbf16> to vector<1x4x295xbf16>
    %55 = vector.shape_cast %19 : vector<4x295xbf16> to vector<1x4x295xbf16>
    %56 = vector.shape_cast %20 : vector<4x295xbf16> to vector<1x4x295xbf16>
    %57 = vector.shape_cast %21 : vector<4x295xbf16> to vector<1x4x295xbf16>
    %58 = vector.shape_cast %22 : vector<4x295xbf16> to vector<1x4x295xbf16>
    %59 = vector.shape_cast %23 : vector<4x295xbf16> to vector<1x4x295xbf16>
    %60 = vector.shape_cast %24 : vector<4x295xbf16> to vector<1x4x295xbf16>
    %61 = vector.shape_cast %25 : vector<4x295xbf16> to vector<1x4x295xbf16>
    %62 = vector.shape_cast %26 : vector<4x295xbf16> to vector<1x4x295xbf16>
    %63 = vector.shape_cast %27 : vector<4x295xbf16> to vector<1x4x295xbf16>
    %64 = vector.shape_cast %28 : vector<4x295xbf16> to vector<1x4x295xbf16>
    %65 = vector.shape_cast %29 : vector<4x295xbf16> to vector<1x4x295xbf16>
    %66 = vector.shape_cast %30 : vector<4x295xbf16> to vector<1x4x295xbf16>
    %67 = vector.shape_cast %31 : vector<4x295xbf16> to vector<1x4x295xbf16>
    %68 = vector.shape_cast %32 : vector<4x295xbf16> to vector<1x4x295xbf16>
    %69 = vector.shape_cast %33 : vector<4x295xbf16> to vector<1x4x295xbf16>
    %70 = vector.shape_cast %34 : vector<4x295xbf16> to vector<1x4x295xbf16>
    %71 = vector.shape_cast %35 : vector<4x295xbf16> to vector<1x4x295xbf16>
    %72 = vector.shape_cast %36 : vector<4x295xbf16> to vector<1x4x295xbf16>
    %73 = vector.shape_cast %37 : vector<4x295xbf16> to vector<1x4x295xbf16>
    %74 = tpu.concatenate %38, %39, %40, %41, %42, %43, %44, %45, %46, %47, %48, %49, %50, %51, %52, %53 in 0 : vector<1x4x295xbf16>, vector<1x4x295xbf16>, vector<1x4x295xbf16>, vector<1x4x295xbf16>, vector<1x4x295xbf16>, vector<1x4x295xbf16>, vector<1x4x295xbf16>, vector<1x4x295xbf16>, vector<1x4x295xbf16>, vector<1x4x295xbf16>, vector<1x4x295xbf16>, vector<1x4x295xbf16>, vector<1x4x295xbf16>, vector<1x4x295xbf16>, vector<1x4x295xbf16>, vector<1x4x295xbf16> -> vector<16x4x295xbf16>
    %75 = tpu.concatenate %54, %55, %56, %57, %58, %59, %60, %61, %62, %63, %64, %65, %66, %67, %68, %69 in 0 : vector<1x4x295xbf16>, vector<1x4x295xbf16>, vector<1x4x295xbf16>, vector<1x4x295xbf16>, vector<1x4x295xbf16>, vector<1x4x295xbf16>, vector<1x4x295xbf16>, vector<1x4x295xbf16>, vector<1x4x295xbf16>, vector<1x4x295xbf16>, vector<1x4x295xbf16>, vector<1x4x295xbf16>, vector<1x4x295xbf16>, vector<1x4x295xbf16>, vector<1x4x295xbf16>, vector<1x4x295xbf16> -> vector<16x4x295xbf16>
    %76 = tpu.concatenate %70, %71, %72, %73 in 0 : vector<1x4x295xbf16>, vector<1x4x295xbf16>, vector<1x4x295xbf16>, vector<1x4x295xbf16> -> vector<4x4x295xbf16>
    %77 = tpu.concatenate %74, %75, %76 in 0 : vector<16x4x295xbf16>, vector<16x4x295xbf16>, vector<4x4x295xbf16> -> vector<36x4x295xbf16>
    %78 = vector.shape_cast %77 : vector<36x4x295xbf16> to vector<144x295xbf16>
    %c0_3 = arith.constant 0 : index
    %c0_4 = arith.constant 0 : index
    %c0_5 = arith.constant 0 : index
    %79 = vector.load %arg3[%c0_3, %c0_4, %c0_5] : memref<1x8x144xbf16, #tpu.memory_space<vmem>>, vector<1x8x144xbf16>
    %80 = vector.shape_cast %79 : vector<1x8x144xbf16> to vector<8x144xbf16>
    %cst = arith.constant dense<0.000000e+00> : vector<8x295xf32>
    %81 = tpu.matmul %80, %78, %cst {dimension_numbers = #tpu.dot_dimension_numbers<[1], [0], [0], [1], [0, 0, 1, 1], [], []>} : vector<8x144xbf16>, vector<144x295xbf16>, vector<8x295xf32> -> vector<8x295xf32>
    %c0_6 = arith.constant 0 : index
    %c0_7 = arith.constant 0 : index
    %c0_8 = arith.constant 0 : index
    %82 = vector.load %arg4[%c0_6, %c0_7, %c0_8] : memref<1x8x1xf32, #tpu.memory_space<vmem>>, vector<1x8x1xf32>
    %83 = vector.shape_cast %82 : vector<1x8x1xf32> to vector<8x1xf32>
    %84 = vector.broadcast %83 : vector<8x1xf32> to vector<8x295xf32>
    %85 = arith.addf %81, %84 : vector<8x295xf32>
    %86 = vector.shape_cast %85 : vector<8x295xf32> to vector<1x1x8x295xf32>
    %c0_9 = arith.constant 0 : index
    %c0_10 = arith.constant 0 : index
    %c0_11 = arith.constant 0 : index
    %c0_12 = arith.constant 0 : index
    %87 = vector.load %arg5[%c0_9, %c0_10, %c0_11, %c0_12] : memref<1x1x8x295xf32, #tpu.memory_space<vmem>>, vector<1x1x8x295xf32>
    tpu.vector_store %arg5[%c0_9, %c0_10, %c0_11, %c0_12], %86 {strides = array<i32>} : memref<1x1x8x295xf32, #tpu.memory_space<vmem>>, vector<1x1x8x295xf32>,
    return
  }
  func.func @transform_0(%arg0: i32, %arg1: i32) -> (i32, i32, i32, i32) {
    %c0_i32 = arith.constant 0 : i32
    %c0_i32_0 = arith.constant 0 : i32
    %c0_i32_1 = arith.constant 0 : i32
    return %arg0, %arg1, %c0_i32, %c0_i32_0 : i32, i32, i32, i32
  }
  func.func @transform_1(%arg0: i32, %arg1: i32) -> (i32, i32, i32) {
    %c0_i32 = arith.constant 0 : i32
    %c0_i32_0 = arith.constant 0 : i32
    %c0_i32_1 = arith.constant 0 : i32
    return %arg1, %c0_i32, %c0_i32_0 : i32, i32, i32
  }
  func.func @transform_2(%arg0: i32, %arg1: i32) -> (i32, i32, i32) {
    %c0_i32 = arith.constant 0 : i32
    %c0_i32_0 = arith.constant 0 : i32
    %c0_i32_1 = arith.constant 0 : i32
    return %arg1, %c0_i32, %c0_i32_0 : i32, i32, i32
  }
  func.func @transform_3(%arg0: i32, %arg1: i32) -> (i32, i32, i32, i32) {
    %c0_i32 = arith.constant 0 : i32
    %c0_i32_0 = arith.constant 0 : i32
    %c0_i32_1 = arith.constant 0 : i32
    return %arg0, %arg1, %c0_i32, %c0_i32_0 : i32, i32, i32, i32
  }
}

</mosaic_0001>

<bundles_post_ra>
// kernel: dcls2d_forward.1
= control target key start
LH: loop header
LB: loop body
LE: loop exit
PB: predicated region body
PF: predicated region fallthrough
CT: control target
= control target key end

     0   :  { %s1169_s12 = smov 0   ;;  %s1171_s13 = smov 0   ;;  %s1405_s0 = inlined_call_operand.vmem [shape: bf16[2,1,4,400], index: 0, kind: input, shape index: {}]   ;;  %s1406_s1 = inlined_call_operand.vmem [shape: bf16[1,8,144], index: 1, kind: input, shape index: {}]   ;;  %s1407_s2 = inlined_call_operand.vmem [shape: f32[1,8,1], index: 2, kind: input, shape index: {}]   ;;  %s1408_s3 = inlined_call_operand.vmem [shape: f32[2,1,8,295], index: 3, kind: output, shape index: {}]  }
   0x1   :  { %s1173_s14 = smov 0  }
   0x2 LB: > { %s25_s15 = sadd.s32 1, %s1114_s13  ;;  %p1027_p0 = scmp.ge.s32.totalorder %s1118_s14, 1  ;;  %s1118_s14 = sphi %s1173_s14, %s13_s14   ;;  %s1114_s13 = sphi %s1171_s13, %s1410_s13   ;;  %s1110_s12 = sphi %s1169_s12, %s1409_s12  }
   0x3   : > { %p27_p1 = scmp.ge.s32.totalorder %s25_s15, 2  ;;  %p176_p2 = scmp.lt.s32.totalorder %s1118_s14, 3 }
   0x5   : > { %s1412_s15 = smov (%p27_p1, %s25_s15), 0  ;;  %p177_p3 = pnand %p1027_p0, %p176_p2 }
   0x6   : > { %p217_p4 = scmp.lt.s32.totalorder (!%p177_p3), %s1110_s12, 1  ;;  %s1120_s20 = smov (!%p177_p3), 72  }
   0x7   : > { %180 = sbr.rel (%p177_p3) target bundleno = 513 (0x201), region = 32  ;;  %s1121_s21 = smov (!%p177_p3), 88  }
   0x8   : > { %s1122_s22 = smov (!%p177_p3), 71   ;;  %s1123_s23 = smov (!%p177_p3), 87  }
   0x9   : > { %s1124_s24 = smov (!%p177_p3), 91   ;;  %s1125_s25 = smov (!%p177_p3), 92  }
   0xa   : > { %s1126_s26 = smov (!%p177_p3), 89   ;;  %s1127_s27 = smov (!%p177_p3), 90  }
   0xb   : > { %s1128_s28 = smov (!%p177_p3), 107   ;;  %s1129_s29 = smov (!%p177_p3), 108  }
   0xc   : > { %s1414_s12 = smov (!%p217_p4, %s1110_s12), 1  ;;  %s1130_s30 = smov 109   ;;  %vm305_vm0 = vcmask 719872   ;;  %vm365_vm1 = vcmask 588800   ;;  %vm310_vm2 = vcmask 711680   ;;  %v1140_v12 = vmov 0  }
   0xd   : > { %s1037_s16 = sshll.u32 %s1414_s12, 3  ;;  %s1131_s4 = smov 110   ;;  %854 = vmatprep.subr.bf16.mxu1 %v1140_v12  ;;  %1092 = vset.pattern.permute.xlu1 %v1140_v12  ;;  %vm370_vm3 = vcmask 580608   ;;  %vm345_vm4 = vcmask 752640   ;;  %vm350_vm5 = vcmask 744448   ;;  %vm355_vm6 = vcmask 736256  }
   0xe   : > { %s225_s19 = scalar_lea.vmem %s1405_s0, %s1037_s16  ;;  %s1132_s5 = smov 112   ;;  %1093 = vset.pattern.permute.xlu0 %v1140_v12  ;;  %vm360_vm7 = vcmask 728064   ;;  %vm280_vm8 = vcmask 875520   ;;  %vm275_vm9 = vcmask 883712   ;;  %vm340_vm10 = vcmask 891904  }
   0xf   : > { %v1193_v0 = vld [vmem:[%s225_s19] sm:$0xff]  ;;  %s1133_s6 = smov 127   ;;  %s1134_s7 = smov 126   ;;  %vm335_vm11 = vcmask 900096   ;;  %vm325_vm12 = vcmask 916480   ;;  %vm250_vm13 = vcmask 1039360   ;;  %v474_v50 = vlaneseq }
  0x10   : > { %362 = vrot.lane.b32.xlu1 %v1193_v0, %s1120_s20  ;;  %302 = vrot.lane.b32.xlu0 %v1193_v0, %s1121_s21  ;;  %s1135_s8 = smov 111   ;;  %s1136_s9 = smov 84   ;;  %v1141_v48 = vmov 1983009808   ;;  %vm255_vm14 = vcmask 1031168   ;;  %vm330_vm15 = vcmask 908288  }
  0x11   : > { %s1137_s10 = smov 125   ;;  %s1138_s11 = smov 86   ;;  %v472_v49 = vunpack.c.l.s4 %v1141_v48  ;;  %v475_v57 = vshrl.u32 %v474_v50, 7 }
  0x12   : > { %s1139_s16 = smov 85   ;;  %s1142_s17 = smov 106  }
  0x13   : > { %v473_v56 = vunpack.c.0.s8 %v472_v49  ;;  %s1143_s18 = smov 104   ;;  %s1144_s19 = smov 105  }
  0x14   : > { %367 = vrot.lane.b32.xlu1 %v1193_v0, %s1122_s22  ;;  %307 = vrot.lane.b32.xlu0 %v1193_v0, %s1123_s23  ;;  %s1145_s20 = smov 124   ;;  %s1146_s21 = smov 103  }
  0x15   : > { %s1147_s22 = smov 26   ;;  %s1148_s23 = smov 123  }
  0x18   : > { %347 = vrot.lane.b32.xlu1 %v1193_v0, %s1124_s24  ;;  %342 = vrot.lane.b32.xlu0 %v1193_v0, %s1125_s25 }
  0x1c   : > { %357 = vrot.lane.b32.xlu1 %v1193_v0, %s1126_s26  ;;  %352 = vrot.lane.b32.xlu0 %v1193_v0, %s1127_s27 }
  0x20   : > { %277 = vrot.lane.b32.xlu1 %v1193_v0, %s1128_s28  ;;  %272 = vrot.lane.b32.xlu0 %v1193_v0, %s1129_s29  ;;  %s1038_s28 = smul.u32 24, %s1414_s12 }
  0x24   : > { %337 = vrot.lane.b32.xlu1 %v1193_v0, %s1130_s30  ;;  %332 = vrot.lane.b32.xlu0 %v1193_v0, %s1131_s4  ;;  %s243_s4 = scalar_lea.vmem %s1408_s3, %s1038_s28 }
  0x28   : > { %322 = vrot.lane.b32.xlu1 %v1193_v0, %s1132_s5  ;;  %247 = vrot.lane.b32.xlu0 %v1193_v0, %s1133_s6 }
  0x2c   : > { %252 = vrot.lane.b32.xlu1 %v1193_v0, %s1134_s7  ;;  %327 = vrot.lane.b32.xlu0 %v1193_v0, %s1135_s8 }
  0x30   : > { %372 = vrot.lane.b32.xlu1 %v1193_v0, %s1136_s9  ;;  %257 = vrot.lane.b32.xlu0 %v1193_v0, %s1137_s10 }
  0x34   : > { %312 = vrot.lane.b32.xlu1 %v1193_v0, %s1138_s11  ;;  %317 = vrot.lane.b32.xlu0 %v1193_v0, %s1139_s16 }
  0x82   : > { %v363_v1 = vpop.permute.xlu1 %362  ;;  %v303_v2 = vpop.permute.xlu0 %302 }
  0x83   : > { %v304_v3 = vrot.slane %v303_v2, 2  ;;  %v364_v4 = vrot.slane %v363_v1, 2 }
  0x85   : > { %v1216_v5 = vsel %vm305_vm0, %v303_v2, %v304_v3  ;;  %v366_v10 = vsel %vm365_vm1, %v363_v1, %v364_v4  ;;  %vm260_vm0 = vcmask 1022976   ;;  %v1257_v1 = vsub.s32 %v473_v56, %v475_v57 }
  0x86   : > { %v368_v6 = vpop.permute.xlu1 %367  ;;  %396 = vrot.lane.b32.xlu1 %v1216_v5, %s1136_s9  ;;  %v308_v7 = vpop.permute.xlu0 %307  ;;  %vm809_vm1 = vcmask 130048  }
  0x87   : > { %v309_v8 = vrot.slane %v308_v7, 2  ;;  %v369_v9 = vrot.slane %v368_v6, 2 }
  0x89   : > { %v1220_v11 = vsel %vm310_vm2, %v308_v7, %v309_v8  ;;  %v371_v19 = vsel %vm370_vm3, %v368_v6, %v369_v9  ;;  %vm420_vm2 = vcmask 687104   ;;  %vm315_vm3 = vcmask 703488  }
  0x8a   : > { %v348_v13 = vpop.permute.xlu1 %347  ;;  %400 = vrot.lane.b32.xlu1 %v366_v10, %s1136_s9  ;;  %398 = vrot.lane.b32.xlu0 %v1220_v11, %s1136_s9  ;;  %v572_v14 = vcombine.low %v1216_v5, %v1220_v11  ;;  %v573_v15 = vcombine.high %v1216_v5, %v1220_v11  ;;  %v343_v16 = vpop.permute.xlu0 %342 }
  0x8b   : > { %v344_v17 = vrot.slane %v343_v16, 2  ;;  %v349_v18 = vrot.slane %v348_v13, 2 }
  0x8d   : > { %v346_v20 = vsel %vm345_vm4, %v343_v16, %v344_v17  ;;  %v351_v25 = vsel %vm350_vm5, %v348_v13, %v349_v18  ;;  %v1286_v16 = vld [vmem:[%s1406_s1] sm:$0xff]  ;;  %vm320_vm4 = vcmask 695296   ;;  %vm290_vm5 = vcmask 859136  }
  0x8e   : > { %v358_v21 = vpop.permute.xlu1 %357  ;;  %402 = vrot.lane.b32.xlu0 %v371_v19, %s1136_s9  ;;  %388 = vrot.lane.b32.xlu1 %v346_v20, %s1136_s9  ;;  %v353_v22 = vpop.permute.xlu0 %352  ;;  %v1032_v17 = vcombine.high %v1286_v16, %v1286_v16  ;;  %v455_v18 = vld [vmem:[%s1407_s2] sm:$0xff] }
  0x8f   : > { %v354_v23 = vrot.slane %v353_v22, 2  ;;  %v359_v24 = vrot.slane %v358_v21, 2 }
  0x90   : > { %1034 = vmatprep.mubr.msk.bf16.mxu1 %vm809_vm1, %v1032_v17  ;;  %1033 = vmatprep.mubr.msk.bf16.mxu0 %vm809_vm1, %v1032_v17 }
  0x91   : > { %v356_v26 = vsel %vm355_vm6, %v353_v22, %v354_v23  ;;  %v361_v31 = vsel %vm360_vm7, %v358_v21, %v359_v24  ;;  %vm285_vm6 = vcmask 867328   ;;  %vm295_vm7 = vcmask 850944  }
  0x92   : > { %v278_v27 = vpop.permute.xlu1 %277  ;;  %390 = vrot.lane.b32.xlu0 %v351_v25, %s1136_s9  ;;  %392 = vrot.lane.b32.xlu1 %v356_v26, %s1136_s9  ;;  %v273_v28 = vpop.permute.xlu0 %272 }
  0x93   : > { %v279_v29 = vrot.slane %v278_v27, 2  ;;  %v274_v30 = vrot.slane %v273_v28, 2 }
  0x95   : > { %v1236_v32 = vsel %vm280_vm8, %v278_v27, %v279_v29  ;;  %v1238_v33 = vsel %vm275_vm9, %v273_v28, %v274_v30  ;;  %vm300_vm8 = vcmask 842752   ;;  %vm265_vm9 = vcmask 1014784  }
  0x96   : > { %v338_v34 = vpop.permute.xlu1 %337  ;;  %394 = vrot.lane.b32.xlu0 %v361_v31, %s1136_s9  ;;  %v333_v35 = vpop.permute.xlu0 %332  ;;  %v504_v36 = vcombine.low %v1238_v33, %v1236_v32  ;;  %v505_v37 = vcombine.high %v1238_v33, %v1236_v32 }
  0x97   : > { %v339_v38 = vrot.slane %v338_v34, 2  ;;  %v334_v39 = vrot.slane %v333_v35, 2 }
  0x99   : > { %v341_v40 = vsel %vm340_vm10, %v338_v34, %v339_v38  ;;  %v336_v41 = vsel %vm335_vm11, %v333_v35, %v334_v39  ;;  %vm270_vm10 = vcmask 1006592   ;;  %vm449_vm11 = vcmask 211968  }
  0x9a   : > { %v323_v42 = vpop.permute.xlu1 %322  ;;  %382 = vrot.lane.b32.xlu0 %v341_v40, %s1136_s9  ;;  %380 = vrot.lane.b32.xlu1 %v336_v41, %s1136_s9  ;;  %v248_v43 = vpop.permute.xlu0 %247 }
  0x9b   : > { %v324_v44 = vrot.slane %v323_v42, 2  ;;  %v249_v45 = vrot.slane %v248_v43, 2 }
  0x9d   : > { %v326_v52 = vsel %vm325_vm12, %v323_v42, %v324_v44  ;;  %v251_v53 = vsel %vm250_vm13, %v248_v43, %v249_v45  ;;  %vm896_vm12 = vcmask 318464  }
  0x9e   : > { %v253_v46 = vpop.permute.xlu1 %252  ;;  %386 = vrot.lane.b32.xlu0 %v1236_v32, %s1136_s9  ;;  %384 = vrot.lane.b32.xlu1 %v1238_v33, %s1136_s9  ;;  %v328_v47 = vpop.permute.xlu0 %327  ;;  %v467_v60 = vcombine.low %v1193_v0, %v251_v53  ;;  %v468_v61 = vcombine.high %v1193_v0, %v251_v53 }
  0x9f   : > { %v254_v51 = vrot.slane %v253_v46, 2  ;;  %v329_v54 = vrot.slane %v328_v47, 2 }
  0xa0   : > { %v1260_v4 = vrot.slane %v467_v60, %v1257_v1  ;;  %v1269_v8 = vrot.slane %v468_v61, %v1257_v1 }
  0xa1   : > { %v256_v59 = vsel %vm255_vm14, %v253_v46, %v254_v51  ;;  %v331_v62 = vsel %vm330_vm15, %v328_v47, %v329_v54 }
  0xa2   : > { %376 = vrot.lane.b32.xlu1 %v326_v52, %s1136_s9  ;;  %374 = vrot.lane.b32.xlu0 %v251_v53, %s1136_s9  ;;  %v258_v55 = vpop.permute.xlu0 %257 }
  0xa3   : > { %v259_v58 = vrot.slane %v258_v55, 2 }
  0xa5   : > { %v261_v63 = vsel %vm260_vm0, %v258_v55, %v259_v58 }
  0xa6   : > { %282 = vrot.lane.b32.xlu1 %v1193_v0, %s1142_s17  ;;  %378 = vrot.lane.b32.xlu0 %v331_v62, %s1136_s9  ;;  %v469_v2 = vcombine.low %v256_v59, %v261_v63  ;;  %v470_v3 = vcombine.high %v256_v59, %v261_v63  ;;  %v1297_v20 = vpop.permute.xlu0 %317 }
  0xa8   : > { %v1263_v6 = vrot.slane %v469_v2, %v1257_v1  ;;  %v1266_v7 = vrot.slane %v470_v3, %v1257_v1 }
  0xaa   : > { %292 = vrot.lane.b32.xlu1 %v1193_v0, %s1143_s18  ;;  %287 = vrot.lane.b32.xlu0 %v1193_v0, %s1144_s19  ;;  %v500_v9 = vcombine.high %v1260_v4, %v1263_v6  ;;  %v501_v10 = vcombine.low %v1269_v8, %v1266_v7  ;;  %v499_v13 = vcombine.low %v1260_v4, %v1263_v6 }
  0xae   : > { %262 = vrot.lane.b32.xlu1 %v1193_v0, %s1145_s20  ;;  %297 = vrot.lane.b32.xlu0 %v1193_v0, %s1146_s21 }
  0xb2   : > { %437 = vrot.lane.b32.xlu1 %v1193_v0, %s1147_s22  ;;  %267 = vrot.lane.b32.xlu0 %v1193_v0, %s1148_s23  ;;  %v1293_v0 = vpop.permute.xlu1 %372 }
  0xb6   : > { %441 = vrot.lane.b32.xlu1 %v256_v59, %s1147_s22  ;;  %439 = vrot.lane.b32.xlu0 %v251_v53, %s1147_s22  ;;  %v1295_v19 = vpop.permute.xlu1 %312 }
  0xba   : > { %443 = vrot.lane.b32.xlu0 %v261_v63, %s1147_s22  ;;  %458 = vperm.xlu1 %1092, %v455_v18  }
  0xf8   : > { %v397_v21 = vpop.permute.xlu1 %396 }
  0xf9   : > { %v416_v24 = vrot.slane %v397_v21, 2 }
  0xfb   : > { %v433_v30 = vsel %vm420_vm2, %v397_v21, %v416_v24 }
  0xfc   : > { %v401_v22 = vpop.permute.xlu1 %400  ;;  %v399_v23 = vpop.permute.xlu0 %398 }
  0xfd   : > { %v417_v25 = vrot.slane %v399_v23, 2  ;;  %v418_v26 = vrot.slane %v401_v22, 2 }
  0xff   : > { %v434_v27 = vsel %vm420_vm2, %v399_v23, %v417_v25  ;;  %v435_v38 = vsel %vm420_vm2, %v401_v22, %v418_v26 }
 0x100   : > { %v389_v28 = vpop.permute.xlu1 %388  ;;  %v403_v29 = vpop.permute.xlu0 %402  ;;  %v712_v34 = vcombine.low %v433_v30, %v434_v27  ;;  %v713_v35 = vcombine.high %v433_v30, %v434_v27  ;;  %v314_v27 = vrot.slane %v1295_v19, 2 }
 0x101   : > { %v419_v31 = vrot.slane %v403_v29, 2  ;;  %v412_v44 = vrot.slane %v389_v28, 2 }
 0x102   : > { %v722_v46 = vrot.slane %v712_v34, %v1257_v1  ;;  %v729_v48 = vrot.slane %v713_v35, %v1257_v1  ;;  %v319_v34 = vrot.slane %v1297_v20, 2 }
 0x103   : > { %v436_v39 = vsel %vm420_vm2, %v403_v29, %v419_v31  ;;  %v429_v55 = vsel %vm420_vm2, %v389_v28, %v412_v44 }
 0x104   : > { %v714_v40 = vcombine.low %v435_v38, %v436_v39  ;;  %v715_v41 = vcombine.high %v435_v38, %v436_v39  ;;  %v393_v42 = vpop.permute.xlu1 %392  ;;  %v391_v43 = vpop.permute.xlu0 %390 }
 0x105   : > { %v413_v45 = vrot.slane %v391_v43, 2  ;;  %v414_v50 = vrot.slane %v393_v42, 2 }
 0x106   : > { %v736_v47 = vrot.slane %v714_v40, %v1257_v1  ;;  %v743_v49 = vrot.slane %v715_v41, %v1257_v1 }
 0x107   : > { %v430_v51 = vsel %vm420_vm2, %v391_v43, %v413_v45  ;;  %v431_v60 = vsel %vm420_vm2, %v393_v42, %v414_v50  ;;  %v321_v50 = vsel %vm320_vm4, %v1297_v20, %v319_v34 }
 0x108   : > { %v395_v52 = vpop.permute.xlu0 %394  ;;  %v745_v53 = vcombine.high %v722_v46, %v736_v47  ;;  %v746_v54 = vcombine.low %v729_v48, %v743_v49  ;;  %v744_v57 = vcombine.low %v722_v46, %v736_v47  ;;  %v677_v58 = vcombine.low %v429_v55, %v430_v51 }
 0x109   : > { %v415_v56 = vrot.slane %v395_v52, 2  ;;  %v678_v59 = vcombine.high %v429_v55, %v430_v51  ;;  %v404_v48 = vrot.slane %v1293_v0, 2  ;;  %v316_v49 = vsel %vm315_vm3, %v1295_v19, %v314_v27 }
 0x10a   : > { %813 = vmatprep.subr.bf16.mxu0 %v745_v53  ;;  %855 = vmatpush1.bf16.msra.mxu1 %v746_v54  ;;  %v687_v21 = vrot.slane %v677_v58, %v1257_v1  ;;  %v574_v20 = vcombine.low %v316_v49, %v321_v50 }
 0x10b   : > { %v432_v61 = vsel %vm420_vm2, %v395_v52, %v415_v56  ;;  %814 = vmatpush1.bf16.msra.mxu0 %v744_v57  ;;  %856 = vmatprep.subr.bf16.mxu1 %v1140_v12  ;;  %v694_v22 = vrot.slane %v678_v59, %v1257_v1  ;;  %v421_v19 = vsel %vm420_vm2, %v1293_v0, %v404_v48 }
 0x10c   : > { %v679_v62 = vcombine.low %v431_v60, %v432_v61  ;;  %v680_v63 = vcombine.high %v431_v60, %v432_v61  ;;  %v381_v2 = vpop.permute.xlu1 %380  ;;  %v383_v3 = vpop.permute.xlu0 %382 }
 0x10d   : > { %v408_v17 = vrot.slane %v381_v2, 2  ;;  %v409_v18 = vrot.slane %v383_v3, 2 }
 0x10e   : > { %v701_v23 = vrot.slane %v679_v62, %v1257_v1  ;;  %v708_v24 = vrot.slane %v680_v63, %v1257_v1 }
 0x10f   : > { %v425_v25 = vsel %vm420_vm2, %v381_v2, %v408_v17  ;;  %v426_v26 = vsel %vm420_vm2, %v383_v3, %v409_v18 }
 0x110   : > { %v385_v28 = vpop.permute.xlu1 %384  ;;  %v387_v29 = vpop.permute.xlu0 %386  ;;  %v710_v30 = vcombine.high %v687_v21, %v701_v23  ;;  %v711_v31 = vcombine.low %v694_v22, %v708_v24  ;;  %v709_v39 = vcombine.low %v687_v21, %v701_v23  ;;  %v642_v40 = vcombine.low %v425_v25, %v426_v26 }
 0x111   : > { %v410_v35 = vrot.slane %v385_v28, 2  ;;  %v411_v38 = vrot.slane %v387_v29, 2  ;;  %v643_v41 = vcombine.high %v425_v25, %v426_v26  ;;  %v575_v21 = vcombine.high %v316_v49, %v321_v50 }
 0x112   : > { %815 = vmatprep.subr.bf16.mxu0 %v710_v30  ;;  %857 = vmatpush1.bf16.msra.mxu1 %v711_v31  ;;  %v652_v52 = vrot.slane %v642_v40, %v1257_v1  ;;  %v596_v25 = vrot.slane %v574_v20, %v1257_v1 }
 0x113   : > { %v427_v42 = vsel %vm420_vm2, %v385_v28, %v410_v35  ;;  %v428_v43 = vsel %vm420_vm2, %v387_v29, %v411_v38  ;;  %816 = vmatpush1.bf16.msra.mxu0 %v709_v39  ;;  %858 = vmatprep.subr.bf16.mxu1 %v1140_v12  ;;  %v659_v53 = vrot.slane %v643_v41, %v1257_v1 }
 0x114   : > { %v644_v44 = vcombine.low %v427_v42, %v428_v43  ;;  %v645_v45 = vcombine.high %v427_v42, %v428_v43  ;;  %v377_v46 = vpop.permute.xlu1 %376  ;;  %v375_v47 = vpop.permute.xlu0 %374  ;;  %v582_v38 = vrot.slane %v572_v14, %v1257_v1  ;;  %v603_v39 = vrot.slane %v575_v21, %v1257_v1 }
 0x115   : > { %v405_v51 = vrot.slane %v375_v47, 2  ;;  %v406_v56 = vrot.slane %v377_v46, 2 }
 0x116   : > { %v666_v54 = vrot.slane %v644_v44, %v1257_v1  ;;  %v673_v55 = vrot.slane %v645_v45, %v1257_v1  ;;  %v605_v14 = vcombine.high %v582_v38, %v596_v25 }
 0x117   : > { %v422_v57 = vsel %vm420_vm2, %v375_v47, %v405_v51  ;;  %v423_v17 = vsel %vm420_vm2, %v377_v46, %v406_v56  ;;  %v589_v47 = vrot.slane %v573_v15, %v1257_v1  ;;  %v604_v56 = vcombine.low %v582_v38, %v596_v25 }
 0x118   : > { %v283_v58 = vpop.permute.xlu1 %282  ;;  %v379_v59 = vpop.permute.xlu0 %378  ;;  %v675_v60 = vcombine.high %v652_v52, %v666_v54  ;;  %v676_v61 = vcombine.low %v659_v53, %v673_v55  ;;  %v674_v63 = vcombine.low %v652_v52, %v666_v54  ;;  %v607_v2 = vcombine.low %v421_v19, %v422_v57 }
 0x119   : > { %v407_v62 = vrot.slane %v379_v59, 2  ;;  %v608_v3 = vcombine.high %v421_v19, %v422_v57  ;;  %v284_v26 = vrot.slane %v283_v58, 2  ;;  %v606_v11 = vcombine.low %v589_v47, %v603_v39 }
 0x11a   : > { %817 = vmatprep.subr.bf16.mxu0 %v675_v60  ;;  %859 = vmatpush1.bf16.msra.mxu1 %v676_v61  ;;  %v617_v28 = vrot.slane %v607_v2, %v1257_v1  ;;  %v533_v25 = vrot.slane %v505_v37, %v1257_v1 }
 0x11b   : > { %v424_v18 = vsel %vm420_vm2, %v379_v59, %v407_v62  ;;  %818 = vmatpush1.bf16.msra.mxu0 %v674_v63  ;;  %860 = vmatprep.subr.bf16.mxu1 %v1140_v12  ;;  %v624_v29 = vrot.slane %v608_v3, %v1257_v1  ;;  %v286_v44 = vsel %vm285_vm6, %v283_v58, %v284_v26 }
 0x11c   : > { %v609_v22 = vcombine.low %v423_v17, %v424_v18  ;;  %v610_v23 = vcombine.high %v423_v17, %v424_v18  ;;  %v293_v24 = vpop.permute.xlu1 %292  ;;  %v288_v0 = vpop.permute.xlu0 %287 }
 0x11d   : > { %v289_v27 = vrot.slane %v288_v0, 2  ;;  %v294_v34 = vrot.slane %v293_v24, 2 }
 0x11e   : > { %v631_v30 = vrot.slane %v609_v22, %v1257_v1  ;;  %v638_v31 = vrot.slane %v610_v23, %v1257_v1  ;;  %v526_v23 = vrot.slane %v504_v36, %v1257_v1 }
 0x11f   : > { %v291_v35 = vsel %vm290_vm5, %v288_v0, %v289_v27  ;;  %v296_v50 = vsel %vm295_vm7, %v293_v24, %v294_v34 }
 0x120   : > { %v263_v40 = vpop.permute.xlu1 %262  ;;  %v298_v41 = vpop.permute.xlu0 %297  ;;  %v640_v42 = vcombine.high %v617_v28, %v631_v30  ;;  %v641_v43 = vcombine.low %v624_v29, %v638_v31  ;;  %v639_v46 = vcombine.low %v617_v28, %v631_v30  ;;  %v537_v48 = vcombine.low %v286_v44, %v291_v35 }
 0x121   : > { %v299_v45 = vrot.slane %v298_v41, 2  ;;  %v538_v49 = vcombine.high %v286_v44, %v291_v35  ;;  %v264_v51 = vrot.slane %v263_v40, 2 }
 0x122   : > { %819 = vmatprep.subr.bf16.mxu0 %v640_v42  ;;  %861 = vmatpush1.bf16.msra.mxu1 %v641_v43  ;;  %v547_v57 = vrot.slane %v537_v48, %v1257_v1 }
 0x123   : > { %v301_v52 = vsel %vm300_vm8, %v298_v41, %v299_v45  ;;  %820 = vmatpush1.bf16.msra.mxu0 %v639_v46  ;;  %862 = vmatprep.subr.bf16.mxu1 %v1140_v12  ;;  %v554_v58 = vrot.slane %v538_v49, %v1257_v1  ;;  %v266_v61 = vsel %vm265_vm9, %v263_v40, %v264_v51 }
 0x124   : > { %v539_v53 = vcombine.low %v296_v50, %v301_v52  ;;  %v540_v54 = vcombine.high %v296_v50, %v301_v52  ;;  %v438_v55 = vpop.permute.xlu1 %437  ;;  %821 = vmatprep.subr.bf16.mxu0 %v605_v14  ;;  %v268_v5 = vpop.permute.xlu0 %267  ;;  %v1031_v46 = vcombine.low %v1286_v16, %v1286_v16 }
 0x125   : > { %v269_v15 = vrot.slane %v268_v5, 2  ;;  %v445_v18 = vrot.slane %v438_v55, 2 }
 0x126   : > { %v561_v59 = vrot.slane %v539_v53, %v1257_v1  ;;  %v568_v60 = vrot.slane %v540_v54, %v1257_v1  ;;  %863 = vmatpush1.bf16.msra.mxu1 %v606_v11 }
 0x127   : > { %v271_v19 = vsel %vm270_vm10, %v268_v5, %v269_v15  ;;  %822 = vmatpush1.bf16.msra.mxu0 %v604_v56  ;;  %864 = vmatprep.subr.bf16.mxu1 %v1140_v12  ;;  %v450_v30 = vsel %vm449_vm11, %v438_v55, %v445_v18 }
 0x128   : > { %v502_v20 = vcombine.low %v266_v61, %v271_v19  ;;  %v503_v62 = vcombine.high %v266_v61, %v271_v19  ;;  %v442_v63 = vpop.permute.xlu1 %441  ;;  %v440_v2 = vpop.permute.xlu0 %439  ;;  %v570_v3 = vcombine.high %v547_v57, %v561_v59  ;;  %v571_v17 = vcombine.low %v554_v58, %v568_v60 }
 0x129   : > { %v446_v21 = vrot.slane %v440_v2, 2  ;;  %v569_v22 = vcombine.low %v547_v57, %v561_v59  ;;  %v447_v26 = vrot.slane %v442_v63, 2 }
 0x12a   : > { %v512_v24 = vrot.slane %v502_v20, %v1257_v1  ;;  %v519_v0 = vrot.slane %v503_v62, %v1257_v1  ;;  %823 = vmatprep.subr.bf16.mxu0 %v570_v3  ;;  %865 = vmatpush1.bf16.msra.mxu1 %v571_v17 }
 0x12b   : > { %v451_v27 = vsel %vm449_vm11, %v440_v2, %v446_v21  ;;  %824 = vmatpush1.bf16.msra.mxu0 %v569_v22  ;;  %866 = vmatprep.subr.bf16.mxu1 %v1140_v12  ;;  %v452_v32 = vsel %vm449_vm11, %v442_v63, %v447_v26 }
 0x12c   : > { %v444_v28 = vpop.permute.xlu0 %443  ;;  %v535_v36 = vcombine.high %v512_v24, %v526_v23  ;;  %v536_v29 = vcombine.low %v519_v0, %v533_v25  ;;  %v534_v34 = vcombine.low %v512_v24, %v526_v23  ;;  %v747_v35 = vcombine.low %v450_v30, %v451_v27 }
 0x12d   : > { %v448_v31 = vrot.slane %v444_v28, 2  ;;  %v748_v38 = vcombine.high %v450_v30, %v451_v27 }
 0x12e   : > { %825 = vmatprep.subr.bf16.mxu0 %v535_v36  ;;  %867 = vmatpush1.bf16.msra.mxu1 %v536_v29  ;;  %v757_v40 = vrot.slane %v747_v35, %v1257_v1 }
 0x12f   : > { %v453_v33 = vsel %vm449_vm11, %v444_v28, %v448_v31  ;;  %826 = vmatpush1.bf16.msra.mxu0 %v534_v34  ;;  %868 = vmatprep.subr.bf16.mxu1 %v1140_v12  ;;  %v764_v41 = vrot.slane %v748_v38, %v1257_v1 }
 0x130   : > { %v749_v37 = vcombine.low %v452_v32, %v453_v33  ;;  %v750_v39 = vcombine.high %v452_v32, %v453_v33  ;;  %827 = vmatprep.subr.bf16.mxu0 %v500_v9 }
 0x132   : > { %v771_v42 = vrot.slane %v749_v37, %v1257_v1  ;;  %v778_v43 = vrot.slane %v750_v39, %v1257_v1  ;;  %869 = vmatpush1.bf16.msra.mxu1 %v501_v10 }
 0x133   : > { %828 = vmatpush1.bf16.msra.mxu0 %v499_v13  ;;  %884 = vmatprep.subr.bf16.mxu1 %v1140_v12 }
 0x134   : > { %v780_v9 = vcombine.high %v757_v40, %v771_v42  ;;  %v781_v44 = vcombine.low %v764_v41, %v778_v43  ;;  %v779_v45 = vcombine.low %v757_v40, %v771_v42 }
 0x135   : > { %v459_v1 = vpop.permute.xlu1 %458 }
 0x136   : > { %843 = vmatprep.subr.bf16.mxu0 %v780_v9  ;;  %885 = vmatpush2.bf16.msra.mxu1 %v781_v44 }
 0x137   : > { %844 = vmatpush2.bf16.msra.mxu0 %v779_v45 }
 0x139   : > { %887 = vmatmul.mubr.bf16.vlgmr.msra.gmra.mxu1 %v1031_v46 }
 0x13a   : > { %846 = vmatmul.mubr.bf16.vlgmr.msra.gmra.mxu0 %v1031_v46 }
 0x1f9   : > { %v888_v7 = vpop.f32.mrf.mxu1 }
 0x1fa   : > { %v889_v12 = vadd.f32 %v888_v7, %v459_v1  ;;  %v847_v4 = vpop.f32.mrf.mxu0 }
 0x1fb   : > { %v848_v6 = vadd.f32 %v847_v4, %v459_v1  ;;  %v890_v8 = vpop.f32.mrf.mxu1 }
 0x1fc   : > { %897 = vst.msk [vmem:[%s243_s4 + $0x10] sm:$0xff] %vm896_vm12, %v889_v12  ;;  %v849_v10 = vpop.f32.mrf.mxu0 }
 0x1fd   : > { %894 = vst [vmem:[%s243_s4] sm:$0xff] %v848_v6  ;;  %v850_v13 = vadd.f32 %v849_v10, %v459_v1  ;;  %v891_v16 = vpop.f32.mrf.mxu1 }
 0x1fe   : > { %v851_v47 = vpop.f32.mrf.mxu0 }
 0x1ff   : > { %895 = vst [vmem:[%s243_s4 + $0x8] sm:$0xff] %v850_v13  ;;  %v892_v48 = vpop.f32.mrf.mxu1 }
 0x200   : > { %v852_v49 = vpop.f32.mrf.mxu0 }
 0x201 PF: > { %s13_s14 = sadd.s32 1, %s1118_s14   ;;  %s1409_s12 = smov %s1114_s13 }
 0x202   : > { %p10_p5 = scmp.ge.s32.totalorder %s13_s14, 4   ;;  %s1410_s13 = smov %s1412_s15 }
 0x204   :  { %12 = sbr.rel (!%p10_p5) target bundleno = 2 (0x2), region = 68 }

</bundles_post_ra>
